<compile_context>
chip_gen: v6e
topology: v6e:2x2x1
jax: 0.10.0
libtpu: 0.0.40
codegen_flags: <defaults>
</compile_context>

<pallas_src>
import functools

import jax
import jax.numpy as jnp
from jax.experimental import pallas as pl
from jax.experimental.pallas import tpu as pltpu


def _dp_kernel(xc_ref, xh_ref, mc_ref, mh_ref, b1_ref, b2_ref,
               w1_ref, g1_ref, be1_ref, w2_ref,
               wpg_ref, swpg_ref, bpp_ref, o_ref,
               *, K, TT, F, eps):
    pad = K // 2
    halo = 2 * pad                      # right-halo columns needed by 2 convs
    W = TT + 2 * halo                   # conv-1 input window width
    W1 = TT + 2 * pad                   # conv-1 output width == conv-2 input
    tail = W - TT                       # columns taken from the halo operand
    inv_F = 1.0 / F
    cd = w1_ref.dtype                   # matmul compute dtype (bf16 or f32)

    # ---- assemble (core + right-halo) window, mask the input ---------------
    x_win = jnp.concatenate([xc_ref[0], xh_ref[0, :, :tail]], axis=1)   # (C, W)
    m_win = jnp.concatenate([mc_ref[0], mh_ref[0, :, :tail]], axis=1)   # (1, W) f32
    xt = x_win * m_win.astype(cd)       # spec: conv_1(x * x_mask)

    ones_f = jnp.ones((1, F), jnp.float32)

    def conv(xin, w_flat_ref, width):
        # One fused MXU contraction over K*C: stack K shifted views along the
        # sublane (contraction) axis.  (v7x alternative: K accumulating dots.)
        xcol = jnp.concatenate([xin[:, k:k + width] for k in range(K)], axis=0)
        return jnp.dot(w_flat_ref[...], xcol, preferred_element_type=jnp.float32)

    # ---- layer 1: conv -> +bias -> relu -> LayerNorm ------------------------
    h = conv(xt, w1_ref, W1) + b1_ref[0]                 # (F, W1) f32
    h = jnp.maximum(h, 0.0)
    # LN stats as two independent 1-row MXU dots (no mean->center->dot chain).
    mean1 = jnp.dot(ones_f, h, preferred_element_type=jnp.float32) * inv_F
    msq1 = jnp.dot(ones_f, h * h, preferred_element_type=jnp.float32) * inv_F
    inv1 = jax.lax.rsqrt(msq1 - mean1 * mean1 + eps)
    h = (h - mean1) * inv1 * g1_ref[...] + be1_ref[...]
    # TODO(synk): dropout implemented as inference-mode identity (nn.Dropout.eval()).

    # ---- layer 2: mask -> conv -> +bias -> relu -----------------------------
    hm = (h * m_win[:, pad:pad + W1]).astype(cd)         # (F, W1)
    h2 = conv(hm, w2_ref, TT) + b2_ref[0]                # (F, TT) f32
    h2 = jnp.maximum(h2, 0.0)

    # ---- LayerNorm-2 folded into the 1x1 projection --------------------------
    #   y = wp @ (gamma2*(h2-mean2)*inv2 + beta2) + bp
    #     = ((wp*gamma2) @ h2 - sum(wp*gamma2)*mean2) * inv2 + (wp@beta2 + bp)
    s2 = jnp.dot(ones_f, h2, preferred_element_type=jnp.float32)         # (1, TT)
    ss2 = jnp.dot(ones_f, h2 * h2, preferred_element_type=jnp.float32)   # (1, TT)
    mean2 = s2 * inv_F
    inv2 = jax.lax.rsqrt(ss2 * inv_F - mean2 * mean2 + eps)
    p = jnp.dot(wpg_ref[...], h2, preferred_element_type=jnp.float32)    # (1, TT)
    y = (p - swpg_ref[...] * mean2) * inv2 + bpp_ref[...]

    m_out = m_win[:, 2 * pad:2 * pad + TT]               # (1, TT)
    o_ref[0] = (y * m_out).astype(o_ref.dtype)           # post-dot mask only


def duration_predictor_forward(x, x_mask, spkr_vec, speed, gst, params,
                               *, use_bf16=True, time_tile=512):
    N, C_in, T = x.shape
    F_ = params["w1"].shape[0]
    K = params["w1"].shape[2]
    pad = K // 2
    halo = 2 * pad
    assert K % 2 == 1 and 2 * halo <= 128, "kernel_size must be odd and <= 65"
    cd = jnp.bfloat16 if use_bf16 else jnp.float32

    # ---- glue: speaker / speed / gst global biases + conv biases ------------
    gb = spkr_vec @ params["spkr_w"].T + params["spkr_b"]
    gb = gb + speed[:, None] @ params["speed_w"].T + params["speed_b"]
    if gst is not None:
        gb = gb + gst @ params["gst_w"].T + params["gst_b"]
    b1 = (gb[:, :F_] + params["b1"][None, :]).reshape(N, F_, 1).astype(jnp.float32)
    b2 = (gb[:, F_:] + params["b2"][None, :]).reshape(N, F_, 1).astype(jnp.float32)

    # ---- one big lane-dense time tile; pad Tp up to a multiple of it --------
    TT = max(128, min((time_tile // 128) * 128, pl.cdiv(T, 128) * 128))
    nt = pl.cdiv(T, TT)
    Tp = nt * TT
    TpH = Tp + 128                       # room for the last tile's halo block

    # single zero-padded copy of x / mask (no overlapping per-tile stack)
    xp = jnp.pad(x.astype(cd), ((0, 0), (0, 0), (halo, TpH - T - halo)))
    mp = jnp.pad(x_mask.astype(jnp.float32), ((0, 0), (0, 0), (halo, TpH - T - halo)))

    # ---- weights in fused-contraction, kernel-friendly layouts --------------
    # w_flat[f, k*C + c] = w[f, c, k]
    w1f = jnp.transpose(params["w1"], (0, 2, 1)).reshape(F_, K * C_in).astype(cd)
    w2f = jnp.transpose(params["w2"], (0, 2, 1)).reshape(F_, K * F_).astype(cd)
    g1 = params["gamma1"].reshape(F_, 1).astype(jnp.float32)
    be1 = params["beta1"].reshape(F_, 1).astype(jnp.float32)
    # LayerNorm-2 affine folded into the 1x1 projection (kept in f32).
    wp = params["wp"].reshape(1, F_).astype(jnp.float32)
    wpg = wp * params["gamma2"][None, :].astype(jnp.float32)            # (1, F)
    swpg = jnp.sum(wpg).reshape(1, 1)
    bpp = (wp @ params["beta2"].reshape(F_, 1).astype(jnp.float32)
           + params["bp"].reshape(1, 1).astype(jnp.float32))

    kernel = functools.partial(_dp_kernel, K=K, TT=TT, F=F_, eps=1e-4)
    blk = TT // 128                       # halo operand: 128-lane block stride

    def const(shape):
        return pl.BlockSpec(shape, lambda n, j: (0,) * len(shape))

    out = pl.pallas_call(
        kernel,
        out_shape=jax.ShapeDtypeStruct((N, 1, Tp), jnp.float32),
        grid=(N, nt),
        in_specs=[
            pl.BlockSpec((1, C_in, TT), lambda n, j: (n, 0, j)),               # x core
            pl.BlockSpec((1, C_in, 128), lambda n, j: (n, 0, (j + 1) * blk)),  # x halo
            pl.BlockSpec((1, 1, TT), lambda n, j: (n, 0, j)),                  # mask core
            pl.BlockSpec((1, 1, 128), lambda n, j: (n, 0, (j + 1) * blk)),     # mask halo
            pl.BlockSpec((1, F_, 1), lambda n, j: (n, 0, 0)),                  # bias 1
            pl.BlockSpec((1, F_, 1), lambda n, j: (n, 0, 0)),                  # bias 2
            const((F_, K * C_in)),                                             # conv1 w (flat)
            const((F_, 1)), const((F_, 1)),                                    # gamma1, beta1
            const((F_, K * F_)),                                               # conv2 w (flat)
            const((1, F_)), const((1, 1)), const((1, 1)),                      # wp*g2, sum, bp'
        ],
        out_specs=pl.BlockSpec((1, 1, TT), lambda n, j: (n, 0, j)),
        compiler_params=pltpu.CompilerParams(
            dimension_semantics=("parallel", "parallel")),
    )(xp, xp, mp, mp, b1, b2, w1f, g1, be1, w2f, wpg, swpg, bpp)

    return out[:, 0, :T]                 # .squeeze(1) -> (N, T)


def ref_forward(x, x_mask, spkr_vec, speed, gst, params):
    """Pure-JAX reference for correctness checking."""
    N, C_in, T = x.shape
    F_ = params["w1"].shape[0]
    K = params["w1"].shape[2]
    pad = K // 2
    hp = jax.lax.Precision.HIGHEST

    gb = spkr_vec @ params["spkr_w"].T + params["spkr_b"]
    gb = gb + speed[:, None] @ params["speed_w"].T + params["speed_b"]
    if gst is not None:
        gb = gb + gst @ params["gst_w"].T + params["gst_b"]
    bias1 = gb[:, :F_][:, :, None]
    bias2 = gb[:, F_:][:, :, None]

    def conv(xin, w, b):
        xp_ = jnp.pad(xin, ((0, 0), (0, 0), (pad, pad)))
        win = jnp.stack([xp_[:, :, k:k + T] for k in range(K)], axis=-1)  # (N,C,T,K)
        return jnp.einsum('nctk,ock->not', win, w, precision=hp) + b[None, :, None]

    def ln(h, gamma, beta):
        m = jnp.mean(h, axis=1, keepdims=True)
        v = jnp.mean((h - m) ** 2, axis=1, keepdims=True)
        return ((h - m) * jax.lax.rsqrt(v + 1e-4) * gamma[None, :, None]
                + beta[None, :, None])

    h = conv(x * x_mask, params["w1"], params["b1"]) + bias1
    h = jnp.maximum(h, 0.0)
    h = ln(h, params["gamma1"], params["beta1"])
    h = conv(h * x_mask, params["w2"], params["b2"]) + bias2
    h = jnp.maximum(h, 0.0)
    h = ln(h, params["gamma2"], params["beta2"])
    y = (jnp.einsum('nct,oc->not', h * x_mask, params["wp"][:, :, 0], precision=hp)
         + params["bp"][None, :, None])
    return (y * x_mask)[:, 0, :]


if __name__ == "__main__":
    key = jax.random.PRNGKey(0)
    N, C_in, F_, K = 2, 8, 32, 3
    spkr_dim, gst_dim = 16, 8
    keys = jax.random.split(key, 18)

    params = {
        "w1": 0.1 * jax.random.normal(keys[0], (F_, C_in, K), jnp.float32),
        "b1": 0.1 * jax.random.normal(keys[1], (F_,), jnp.float32),
        "gamma1": jnp.ones((F_,), jnp.float32),
        "beta1": jnp.zeros((F_,), jnp.float32),
        "w2": 0.1 * jax.random.normal(keys[2], (F_, F_, K), jnp.float32),
        "b2": 0.1 * jax.random.normal(keys[3], (F_,), jnp.float32),
        "gamma2": jnp.ones((F_,), jnp.float32),
        "beta2": jnp.zeros((F_,), jnp.float32),
        "wp": 0.1 * jax.random.normal(keys[4], (1, F_, 1), jnp.float32),
        "bp": 0.1 * jax.random.normal(keys[5], (1,), jnp.float32),
        "spkr_w": 0.1 * jax.random.normal(keys[6], (2 * F_, spkr_dim), jnp.float32),
        "spkr_b": 0.1 * jax.random.normal(keys[7], (2 * F_,), jnp.float32),
        "speed_w": 0.1 * jax.random.normal(keys[8], (2 * F_, 1), jnp.float32),
        "speed_b": 0.1 * jax.random.normal(keys[9], (2 * F_,), jnp.float32),
        "gst_w": 0.1 * jax.random.normal(keys[10], (2 * F_, gst_dim), jnp.float32),
        "gst_b": 0.1 * jax.random.normal(keys[11], (2 * F_,), jnp.float32),
    }

    spkr_vec = jax.random.normal(keys[13], (N, spkr_dim), jnp.float32)
    speed = jax.random.uniform(keys[14], (N,), jnp.float32, 0.8, 1.2)
    gst = jax.random.normal(keys[15], (N, gst_dim), jnp.float32)

    # ---- case 1: small T, single time tile ----------------------------------
    T1 = 16
    x1 = jax.random.normal(keys[12], (N, C_in, T1), jnp.float32)
    len1 = jnp.array([T1, T1 - 4])
    mask1 = (jnp.arange(T1)[None, :] < len1[:, None]).astype(jnp.float32)[:, None, :]
    ref1 = ref_forward(x1, mask1, spkr_vec, speed, gst, params)

    out_f32 = jax.block_until_ready(
        duration_predictor_forward(x1, mask1, spkr_vec, speed, gst, params,
                                   use_bf16=False))
    assert out_f32.shape == (N, T1), out_f32.shape
    err = float(jnp.max(jnp.abs(out_f32 - ref1)))
    assert err < 3e-2, f"f32 mismatch: {err}"

    out_bf16 = jax.block_until_ready(
        duration_predictor_forward(x1, mask1, spkr_vec, speed, gst, params,
                                   use_bf16=True))
    errb = float(jnp.max(jnp.abs(out_bf16 - ref1)))
    assert errb < 2e-1, f"bf16 mismatch: {errb}"

    # ---- case 2: multi-tile path (nt = 2) with a forced small time tile -----
    T2 = 200
    x2 = jax.random.normal(keys[16], (N, C_in, T2), jnp.float32)
    len2 = jnp.array([T2, 137])
    mask2 = (jnp.arange(T2)[None, :] < len2[:, None]).astype(jnp.float32)[:, None, :]
    ref2 = ref_forward(x2, mask2, spkr_vec, speed, gst, params)
    out2 = jax.block_until_ready(
        duration_predictor_forward(x2, mask2, spkr_vec, speed, gst, params,
                                   use_bf16=False, time_tile=128))
    assert out2.shape == (N, T2), out2.shape
    err2 = float(jnp.max(jnp.abs(out2 - ref2)))
    assert err2 < 3e-2, f"multi-tile mismatch: {err2}"

    print("KERNEL_OK")
</pallas_src>

<mosaic_0001>
module attributes {stable_mosaic.version = 11 : i64} {
  func.func @_dp_kernel(%arg0: i32, %arg1: i32, %arg2: memref<1x8x128xf32, #tpu.memory_space<vmem>>, %arg3: memref<1x8x128xf32, #tpu.memory_space<vmem>>, %arg4: memref<1x1x128xf32, #tpu.memory_space<vmem>>, %arg5: memref<1x1x128xf32, #tpu.memory_space<vmem>>, %arg6: memref<1x32x1xf32, #tpu.memory_space<vmem>>, %arg7: memref<1x32x1xf32, #tpu.memory_space<vmem>>, %arg8: memref<32x24xf32, #tpu.memory_space<vmem>>, %arg9: memref<32x1xf32, #tpu.memory_space<vmem>>, %arg10: memref<32x1xf32, #tpu.memory_space<vmem>>, %arg11: memref<32x96xf32, #tpu.memory_space<vmem>>, %arg12: memref<1x32xf32, #tpu.memory_space<vmem>>, %arg13: memref<1x1xf32, #tpu.memory_space<vmem>>, %arg14: memref<1x1xf32, #tpu.memory_space<vmem>>, %arg15: memref<1x1x128xf32, #tpu.memory_space<vmem>>) attributes {dimension_semantics = [#tpu.dimension_semantics<parallel>, #tpu.dimension_semantics<parallel>], iteration_bounds = array<i64: 2, 1>, scalar_prefetch = 0 : i64, scratch_operands = 0 : i64, tpu.core_type = #tpu.core_type<tc>, window_params = [{transform_indices = @transform_0, window_bounds = array<i64: 1, 8, 128>}, {transform_indices = @transform_1, window_bounds = array<i64: 1, 8, 128>}, {transform_indices = @transform_2, window_bounds = array<i64: 1, 1, 128>}, {transform_indices = @transform_3, window_bounds = array<i64: 1, 1, 128>}, {transform_indices = @transform_4, window_bounds = array<i64: 1, 32, 1>}, {transform_indices = @transform_5, window_bounds = array<i64: 1, 32, 1>}, {pipeline_mode = #tpu.pipeline_mode<synchronous>, transform_indices = @transform_6, window_bounds = array<i64: 32, 24>}, {pipeline_mode = #tpu.pipeline_mode<synchronous>, transform_indices = @transform_7, window_bounds = array<i64: 32, 1>}, {pipeline_mode = #tpu.pipeline_mode<synchronous>, transform_indices = @transform_8, window_bounds = array<i64: 32, 1>}, {pipeline_mode = #tpu.pipeline_mode<synchronous>, transform_indices = @transform_9, window_bounds = array<i64: 32, 96>}, {pipeline_mode = #tpu.pipeline_mode<synchronous>, transform_indices = @transform_10, window_bounds = array<i64: 1, 32>}, {pipeline_mode = #tpu.pipeline_mode<synchronous>, transform_indices = @transform_11, window_bounds = array<i64: 1, 1>}, {pipeline_mode = #tpu.pipeline_mode<synchronous>, transform_indices = @transform_12, window_bounds = array<i64: 1, 1>}, {transform_indices = @transform_13, window_bounds = array<i64: 1, 1, 128>}]} {
    %c0 = arith.constant 0 : index
    %c0_0 = arith.constant 0 : index
    %c0_1 = arith.constant 0 : index
    %0 = vector.load %arg2[%c0, %c0_0, %c0_1] : memref<1x8x128xf32, #tpu.memory_space<vmem>>, vector<1x8x128xf32>
    %1 = vector.shape_cast %0 : vector<1x8x128xf32> to vector<8x128xf32>
    %c0_2 = arith.constant 0 : index
    %c0_3 = arith.constant 0 : index
    %c0_4 = arith.constant 0 : index
    %2 = vector.load %arg3[%c0_2, %c0_3, %c0_4] : memref<1x8x128xf32, #tpu.memory_space<vmem>>, vector<1x8x4xf32>
    %3 = vector.shape_cast %2 : vector<1x8x4xf32> to vector<8x4xf32>
    %4 = tpu.concatenate %1, %3 in 1 : vector<8x128xf32>, vector<8x4xf32> -> vector<8x132xf32>
    %c0_5 = arith.constant 0 : index
    %c0_6 = arith.constant 0 : index
    %c0_7 = arith.constant 0 : index
    %5 = vector.load %arg4[%c0_5, %c0_6, %c0_7] : memref<1x1x128xf32, #tpu.memory_space<vmem>>, vector<1x1x128xf32>
    %6 = vector.shape_cast %5 : vector<1x1x128xf32> to vector<1x128xf32>
    %c0_8 = arith.constant 0 : index
    %c0_9 = arith.constant 0 : index
    %c0_10 = arith.constant 0 : index
    %7 = vector.load %arg5[%c0_8, %c0_9, %c0_10] : memref<1x1x128xf32, #tpu.memory_space<vmem>>, vector<1x1x4xf32>
    %8 = vector.shape_cast %7 : vector<1x1x4xf32> to vector<1x4xf32>
    %9 = tpu.concatenate %6, %8 in 1 : vector<1x128xf32>, vector<1x4xf32> -> vector<1x132xf32>
    %10 = vector.broadcast %9 : vector<1x132xf32> to vector<8x132xf32>
    %11 = arith.mulf %4, %10 : vector<8x132xf32>
    %cst = arith.constant 1.000000e+00 : f32
    %12 = vector.broadcast %cst : f32 to vector<1x32xf32>
    %13 = vector.extract_strided_slice %11 {offsets = [0, 0], sizes = [8, 130], strides = [1, 1]} : vector<8x132xf32> to vector<8x130xf32>
    %14 = vector.extract_strided_slice %11 {offsets = [0, 1], sizes = [8, 130], strides = [1, 1]} : vector<8x132xf32> to vector<8x130xf32>
    %15 = vector.extract_strided_slice %11 {offsets = [0, 2], sizes = [8, 130], strides = [1, 1]} : vector<8x132xf32> to vector<8x130xf32>
    %16 = tpu.concatenate %13, %14, %15 in 0 : vector<8x130xf32>, vector<8x130xf32>, vector<8x130xf32> -> vector<24x130xf32>
    %c0_11 = arith.constant 0 : index
    %c0_12 = arith.constant 0 : index
    %17 = vector.load %arg8[%c0_11, %c0_12] : memref<32x24xf32, #tpu.memory_space<vmem>>, vector<32x24xf32>
    %cst_13 = arith.constant dense<0.000000e+00> : vector<32x130xf32>
    %18 = tpu.matmul %17, %16, %cst_13 {dimension_numbers = #tpu.dot_dimension_numbers<[1], [0], [0], [1], [0, 0, 1, 1], [], []>} : vector<32x24xf32>, vector<24x130xf32>, vector<32x130xf32> -> vector<32x130xf32>
    %c0_14 = arith.constant 0 : index
    %c0_15 = arith.constant 0 : index
    %c0_16 = arith.constant 0 : index
    %19 = vector.load %arg6[%c0_14, %c0_15, %c0_16] : memref<1x32x1xf32, #tpu.memory_space<vmem>>, vector<1x32x1xf32>
    %20 = vector.shape_cast %19 : vector<1x32x1xf32> to vector<32x1xf32>
    %21 = vector.broadcast %20 : vector<32x1xf32> to vector<32x130xf32>
    %22 = arith.addf %18, %21 : vector<32x130xf32>
    %cst_17 = arith.constant 0.000000e+00 : f32
    %23 = vector.broadcast %cst_17 : f32 to vector<32x130xf32>
    %24 = arith.maximumf %22, %23 : vector<32x130xf32>
    %cst_18 = arith.constant dense<0.000000e+00> : vector<1x130xf32>
    %25 = tpu.matmul %12, %24, %cst_18 {dimension_numbers = #tpu.dot_dimension_numbers<[1], [0], [0], [1], [0, 0, 1, 1], [], []>} : vector<1x32xf32>, vector<32x130xf32>, vector<1x130xf32> -> vector<1x130xf32>
    %cst_19 = arith.constant 3.125000e-02 : f32
    %26 = vector.broadcast %cst_19 : f32 to vector<1x130xf32>
    %27 = arith.mulf %25, %26 : vector<1x130xf32>
    %28 = arith.mulf %24, %24 : vector<32x130xf32>
    %cst_20 = arith.constant dense<0.000000e+00> : vector<1x130xf32>
    %29 = tpu.matmul %12, %28, %cst_20 {dimension_numbers = #tpu.dot_dimension_numbers<[1], [0], [0], [1], [0, 0, 1, 1], [], []>} : vector<1x32xf32>, vector<32x130xf32>, vector<1x130xf32> -> vector<1x130xf32>
    %cst_21 = arith.constant 3.125000e-02 : f32
    %30 = vector.broadcast %cst_21 : f32 to vector<1x130xf32>
    %31 = arith.mulf %29, %30 : vector<1x130xf32>
    %32 = arith.mulf %27, %27 : vector<1x130xf32>
    %33 = arith.subf %31, %32 : vector<1x130xf32>
    %cst_22 = arith.constant 9.99999974E-5 : f32
    %34 = vector.broadcast %cst_22 : f32 to vector<1x130xf32>
    %35 = arith.addf %33, %34 : vector<1x130xf32>
    %36 = math.rsqrt %35 : vector<1x130xf32>
    %37 = vector.broadcast %27 : vector<1x130xf32> to vector<32x130xf32>
    %38 = arith.subf %24, %37 : vector<32x130xf32>
    %39 = vector.broadcast %36 : vector<1x130xf32> to vector<32x130xf32>
    %40 = arith.mulf %38, %39 : vector<32x130xf32>
    %c0_23 = arith.constant 0 : index
    %c0_24 = arith.constant 0 : index
    %41 = vector.load %arg9[%c0_23, %c0_24] : memref<32x1xf32, #tpu.memory_space<vmem>>, vector<32x1xf32>
    %42 = vector.broadcast %41 : vector<32x1xf32> to vector<32x130xf32>
    %43 = arith.mulf %40, %42 : vector<32x130xf32>
    %c0_25 = arith.constant 0 : index
    %c0_26 = arith.constant 0 : index
    %44 = vector.load %arg10[%c0_25, %c0_26] : memref<32x1xf32, #tpu.memory_space<vmem>>, vector<32x1xf32>
    %45 = vector.broadcast %44 : vector<32x1xf32> to vector<32x130xf32>
    %46 = arith.addf %43, %45 : vector<32x130xf32>
    %47 = vector.extract_strided_slice %9 {offsets = [0, 1], sizes = [1, 130], strides = [1, 1]} : vector<1x132xf32> to vector<1x130xf32>
    %48 = vector.broadcast %47 : vector<1x130xf32> to vector<32x130xf32>
    %49 = arith.mulf %46, %48 : vector<32x130xf32>
    %50 = vector.extract_strided_slice %49 {offsets = [0, 0], sizes = [32, 128], strides = [1, 1]} : vector<32x130xf32> to vector<32x128xf32>
    %51 = vector.extract_strided_slice %49 {offsets = [0, 1], sizes = [32, 128], strides = [1, 1]} : vector<32x130xf32> to vector<32x128xf32>
    %52 = vector.extract_strided_slice %49 {offsets = [0, 2], sizes = [32, 128], strides = [1, 1]} : vector<32x130xf32> to vector<32x128xf32>
    %53 = tpu.concatenate %50, %51, %52 in 0 : vector<32x128xf32>, vector<32x128xf32>, vector<32x128xf32> -> vector<96x128xf32>
    %c0_27 = arith.constant 0 : index
    %c0_28 = arith.constant 0 : index
    %54 = vector.load %arg11[%c0_27, %c0_28] : memref<32x96xf32, #tpu.memory_space<vmem>>, vector<32x96xf32>
    %cst_29 = arith.constant dense<0.000000e+00> : vector<32x128xf32>
    %55 = tpu.matmul %54, %53, %cst_29 {dimension_numbers = #tpu.dot_dimension_numbers<[1], [0], [0], [1], [0, 0, 1, 1], [], []>} : vector<32x96xf32>, vector<96x128xf32>, vector<32x128xf32> -> vector<32x128xf32>
    %c0_30 = arith.constant 0 : index
    %c0_31 = arith.constant 0 : index
    %c0_32 = arith.constant 0 : index
    %56 = vector.load %arg7[%c0_30, %c0_31, %c0_32] : memref<1x32x1xf32, #tpu.memory_space<vmem>>, vector<1x32x1xf32>
    %57 = vector.shape_cast %56 : vector<1x32x1xf32> to vector<32x1xf32>
    %58 = vector.broadcast %57 : vector<32x1xf32> to vector<32x128xf32>
    %59 = arith.addf %55, %58 : vector<32x128xf32>
    %cst_33 = arith.constant 0.000000e+00 : f32
    %60 = vector.broadcast %cst_33 : f32 to vector<32x128xf32>
    %61 = arith.maximumf %59, %60 : vector<32x128xf32>
    %cst_34 = arith.constant dense<0.000000e+00> : vector<1x128xf32>
    %62 = tpu.matmul %12, %61, %cst_34 {dimension_numbers = #tpu.dot_dimension_numbers<[1], [0], [0], [1], [0, 0, 1, 1], [], []>} : vector<1x32xf32>, vector<32x128xf32>, vector<1x128xf32> -> vector<1x128xf32>
    %63 = arith.mulf %61, %61 : vector<32x128xf32>
    %cst_35 = arith.constant dense<0.000000e+00> : vector<1x128xf32>
    %64 = tpu.matmul %12, %63, %cst_35 {dimension_numbers = #tpu.dot_dimension_numbers<[1], [0], [0], [1], [0, 0, 1, 1], [], []>} : vector<1x32xf32>, vector<32x128xf32>, vector<1x128xf32> -> vector<1x128xf32>
    %cst_36 = arith.constant 3.125000e-02 : f32
    %65 = vector.broadcast %cst_36 : f32 to vector<1x128xf32>
    %66 = arith.mulf %62, %65 : vector<1x128xf32>
    %cst_37 = arith.constant 3.125000e-02 : f32
    %67 = vector.broadcast %cst_37 : f32 to vector<1x128xf32>
    %68 = arith.mulf %64, %67 : vector<1x128xf32>
    %69 = arith.mulf %66, %66 : vector<1x128xf32>
    %70 = arith.subf %68, %69 : vector<1x128xf32>
    %cst_38 = arith.constant 9.99999974E-5 : f32
    %71 = vector.broadcast %cst_38 : f32 to vector<1x128xf32>
    %72 = arith.addf %70, %71 : vector<1x128xf32>
    %73 = math.rsqrt %72 : vector<1x128xf32>
    %c0_39 = arith.constant 0 : index
    %c0_40 = arith.constant 0 : index
    %74 = vector.load %arg12[%c0_39, %c0_40] : memref<1x32xf32, #tpu.memory_space<vmem>>, vector<1x32xf32>
    %cst_41 = arith.constant dense<0.000000e+00> : vector<1x128xf32>
    %75 = tpu.matmul %74, %61, %cst_41 {dimension_numbers = #tpu.dot_dimension_numbers<[1], [0], [0], [1], [0, 0, 1, 1], [], []>} : vector<1x32xf32>, vector<32x128xf32>, vector<1x128xf32> -> vector<1x128xf32>
    %c0_42 = arith.constant 0 : index
    %c0_43 = arith.constant 0 : index
    %76 = vector.load %arg13[%c0_42, %c0_43] : memref<1x1xf32, #tpu.memory_space<vmem>>, vector<1x1xf32>
    %77 = vector.broadcast %76 : vector<1x1xf32> to vector<1x128xf32>
    %78 = arith.mulf %77, %66 : vector<1x128xf32>
    %79 = arith.subf %75, %78 : vector<1x128xf32>
    %80 = arith.mulf %79, %73 : vector<1x128xf32>
    %c0_44 = arith.constant 0 : index
    %c0_45 = arith.constant 0 : index
    %81 = vector.load %arg14[%c0_44, %c0_45] : memref<1x1xf32, #tpu.memory_space<vmem>>, vector<1x1xf32>
    %82 = vector.broadcast %81 : vector<1x1xf32> to vector<1x128xf32>
    %83 = arith.addf %80, %82 : vector<1x128xf32>
    %84 = vector.extract_strided_slice %9 {offsets = [0, 2], sizes = [1, 128], strides = [1, 1]} : vector<1x132xf32> to vector<1x128xf32>
    %85 = arith.mulf %83, %84 : vector<1x128xf32>
    %c0_46 = arith.constant 0 : index
    %c0_47 = arith.constant 0 : index
    %c0_48 = arith.constant 0 : index
    %86 = vector.load %arg15[%c0_46, %c0_47, %c0_48] : memref<1x1x128xf32, #tpu.memory_space<vmem>>, vector<1x1x128xf32>
    %87 = vector.shape_cast %86 : vector<1x1x128xf32> to vector<1x128xf32>
    %88 = vector.shape_cast %85 : vector<1x128xf32> to vector<1x1x128xf32>
    tpu.vector_store %arg15[%c0_46, %c0_47, %c0_48], %88 {strides = array<i32>} : memref<1x1x128xf32, #tpu.memory_space<vmem>>, vector<1x1x128xf32>,
    return
  }
  func.func @transform_0(%arg0: i32, %arg1: i32) -> (i32, i32, i32) {
    %c0_i32 = arith.constant 0 : i32
    %c0_i32_0 = arith.constant 0 : i32
    return %arg0, %c0_i32, %arg1 : i32, i32, i32
  }
  func.func @transform_1(%arg0: i32, %arg1: i32) -> (i32, i32, i32) {
    %c1_i32 = arith.constant 1 : i32
    %0 = arith.addi %arg1, %c1_i32 : i32
    %c1_i32_0 = arith.constant 1 : i32
    %1 = arith.muli %0, %c1_i32_0 : i32
    %c0_i32 = arith.constant 0 : i32
    %c0_i32_1 = arith.constant 0 : i32
    return %arg0, %c0_i32, %1 : i32, i32, i32
  }
  func.func @transform_2(%arg0: i32, %arg1: i32) -> (i32, i32, i32) {
    %c0_i32 = arith.constant 0 : i32
    %c0_i32_0 = arith.constant 0 : i32
    return %arg0, %c0_i32, %arg1 : i32, i32, i32
  }
  func.func @transform_3(%arg0: i32, %arg1: i32) -> (i32, i32, i32) {
    %c1_i32 = arith.constant 1 : i32
    %0 = arith.addi %arg1, %c1_i32 : i32
    %c1_i32_0 = arith.constant 1 : i32
    %1 = arith.muli %0, %c1_i32_0 : i32
    %c0_i32 = arith.constant 0 : i32
    %c0_i32_1 = arith.constant 0 : i32
    return %arg0, %c0_i32, %1 : i32, i32, i32
  }
  func.func @transform_4(%arg0: i32, %arg1: i32) -> (i32, i32, i32) {
    %c0_i32 = arith.constant 0 : i32
    %c0_i32_0 = arith.constant 0 : i32
    %c0_i32_1 = arith.constant 0 : i32
    return %arg0, %c0_i32, %c0_i32_0 : i32, i32, i32
  }
  func.func @transform_5(%arg0: i32, %arg1: i32) -> (i32, i32, i32) {
    %c0_i32 = arith.constant 0 : i32
    %c0_i32_0 = arith.constant 0 : i32
    %c0_i32_1 = arith.constant 0 : i32
    return %arg0, %c0_i32, %c0_i32_0 : i32, i32, i32
  }
  func.func @transform_6(%arg0: i32, %arg1: i32) -> (i32, i32) {
    %c0_i32 = arith.constant 0 : i32
    %c0_i32_0 = arith.constant 0 : i32
    %c0_i32_1 = arith.constant 0 : i32
    return %c0_i32, %c0_i32_0 : i32, i32
  }
  func.func @transform_7(%arg0: i32, %arg1: i32) -> (i32, i32) {
    %c0_i32 = arith.constant 0 : i32
    %c0_i32_0 = arith.constant 0 : i32
    %c0_i32_1 = arith.constant 0 : i32
    return %c0_i32, %c0_i32_0 : i32, i32
  }
  func.func @transform_8(%arg0: i32, %arg1: i32) -> (i32, i32) {
    %c0_i32 = arith.constant 0 : i32
    %c0_i32_0 = arith.constant 0 : i32
    %c0_i32_1 = arith.constant 0 : i32
    return %c0_i32, %c0_i32_0 : i32, i32
  }
  func.func @transform_9(%arg0: i32, %arg1: i32) -> (i32, i32) {
    %c0_i32 = arith.constant 0 : i32
    %c0_i32_0 = arith.constant 0 : i32
    %c0_i32_1 = arith.constant 0 : i32
    return %c0_i32, %c0_i32_0 : i32, i32
  }
  func.func @transform_10(%arg0: i32, %arg1: i32) -> (i32, i32) {
    %c0_i32 = arith.constant 0 : i32
    %c0_i32_0 = arith.constant 0 : i32
    %c0_i32_1 = arith.constant 0 : i32
    return %c0_i32, %c0_i32_0 : i32, i32
  }
  func.func @transform_11(%arg0: i32, %arg1: i32) -> (i32, i32) {
    %c0_i32 = arith.constant 0 : i32
    %c0_i32_0 = arith.constant 0 : i32
    %c0_i32_1 = arith.constant 0 : i32
    return %c0_i32, %c0_i32_0 : i32, i32
  }
  func.func @transform_12(%arg0: i32, %arg1: i32) -> (i32, i32) {
    %c0_i32 = arith.constant 0 : i32
    %c0_i32_0 = arith.constant 0 : i32
    %c0_i32_1 = arith.constant 0 : i32
    return %c0_i32, %c0_i32_0 : i32, i32
  }
  func.func @transform_13(%arg0: i32, %arg1: i32) -> (i32, i32, i32) {
    %c0_i32 = arith.constant 0 : i32
    %c0_i32_0 = arith.constant 0 : i32
    return %arg0, %c0_i32, %arg1 : i32, i32, i32
  }
}

</mosaic_0001>

<bundles_post_ra>
// kernel: tpu_custom_call.1
= control target key start
LH: loop header
LB: loop body
LE: loop exit
PB: predicated region body
PF: predicated region fallthrough
CT: control target
= control target key end

     0   :  { %s2355_s0 = inlined_call_operand.vmem [shape: f32[2,8,256], index: 0, kind: input, shape index: {}]   ;;  %s2356_s1 = inlined_call_operand.vmem [shape: f32[2,8,256], index: 1, kind: input, shape index: {}]   ;;  %s2357_s2 = inlined_call_operand.vmem [shape: f32[2,1,256], index: 2, kind: input, shape index: {}]   ;;  %s2358_s3 = inlined_call_operand.vmem [shape: f32[2,1,256], index: 3, kind: input, shape index: {}]   ;;  %s2359_s4 = inlined_call_operand.vmem [shape: f32[2,32,1], index: 4, kind: input, shape index: {}]   ;;  %s2360_s5 = inlined_call_operand.vmem [shape: f32[2,32,1], index: 5, kind: input, shape index: {}]   ;;  %s2361_s6 = inlined_call_operand.vmem [shape: f32[32,24], index: 6, kind: input, shape index: {}]   ;;  %s2362_s7 = inlined_call_operand.vmem [shape: f32[32,1], index: 7, kind: input, shape index: {}]   ;;  %s2363_s8 = inlined_call_operand.vmem [shape: f32[32,1], index: 8, kind: input, shape index: {}]   ;;  %s2364_s9 = inlined_call_operand.vmem [shape: f32[32,96], index: 9, kind: input, shape index: {}]   ;;  %s2365_s10 = inlined_call_operand.vmem [shape: f32[1,32], index: 10, kind: input, shape index: {}]   ;;  %s2366_s11 = inlined_call_operand.<no memory space> [shape: f32[1,1], index: 11, kind: input, shape index: {}]   ;;  %s2367_s13 = inlined_call_operand.hbm [shape: f32[2,1,128], index: 13, kind: output, shape index: {}]   ;;  %s2368_s12 = inlined_call_operand.<no memory space> [shape: f32[1,1], index: 12, kind: input, shape index: {}]  }
   0x1   :  { %v18_v0 = vstv %s2366_s11  ;;  %v20_v1 = vstv %s2368_s12 }
   0x2   :  { %19 = vst [vmem:[#allocation2] sm:$0x1] %v18_v0  ;;  %21 = vst [vmem:[#allocation3] sm:$0x1] %v20_v1 }
   0x3   :  { %22 = vsyncpa [#allocation5], 0 }
   0x4   :  { %24 = vsyncpa [#allocation5 + $0x1], 0  ;;  %s2018_s29 = smov 0   ;;  %s2020_s30 = smov 0  }
   0x5   :  { %s2022_s14 = smov 0   ;;  %s2024_s15 = smov 0  }
   0x6   :  { %s2026_s16 = smov 0   ;;  %s2028_s17 = smov 0  }
   0x7 LB: > { %2376 = sst [smem:[#allocation7_spill]] %s1913_s29  ;;  %s1657_s11 = sadd.s32 4294967295, %s1933_s17   ;;  %s1933_s17 = sphi %s2028_s17, %s30_s17   ;;  %s1929_s16 = sphi %s2026_s16, %s2391_s16   ;;  %s1925_s15 = sphi %s2024_s15, %s2390_s15   ;;  %s1921_s14 = sphi %s2022_s14, %s2394_s14   ;;  %s1917_s30 = sphi %s2020_s30, %s2393_s30   ;;  %s1913_s29 = sphi %s2018_s29, %s2392_s29  }
   0x8   : > { %2377 = sst [smem:[#allocation8_spill]] %s1921_s14  ;;  %s1658_s12 = sadd.s32 4294967294, %s1933_s17  }
   0x9   : > { %2378 = sst [smem:[#allocation9_spill]] %s1929_s16  ;;  %s42_s18 = sadd.s32 1, %s1929_s16 }
   0xa   : > { %2379 = sst [smem:[#allocation10_spill]] %s1933_s17  ;;  %s366_s19 = sadd.s32 1, %s1921_s14 }
   0xb   : > { %p44_p0 = scmp.ge.s32.totalorder %s42_s18, 2  ;;  %p376_p1 = scmp.ne.s32.totalorder %s1921_s14, %s1917_s30 }
   0xc   : > { %p377_p2 = scmp.eq.s32.totalorder %s1657_s11, 1  ;;  %p382_p3 = scmp.ne.s32.totalorder %s1917_s30, %s1913_s29 }
   0xd   : > { %s2396_s18 = smov (%p44_p0, %s42_s18), 0  ;;  %p383_p5 = scmp.eq.s32.totalorder %s1658_s12, 1 }
   0xe   : > { %2380 = sst [smem:[#allocation11_spill]] %s2396_s18  ;;  %p2058_p4 = por %p377_p2, %p376_p1 }
   0xf   : > { %s361_s21 = ssub.s32 %s1929_s16, %s2396_s18  ;;  %p1661_p6 = scmp.ge.s32.totalorder %s1933_s17, 1 }
  0x10   : > { %p364_p7 = scmp.eq.s32.totalorder %s361_s21, 0  ;;  %p2065_p8 = por %p383_p5, %p382_p3 }
  0x11   : > { %p484_p9 = scmp.lt.s32.totalorder %s1933_s17, 3 }
  0x12   : > { %s2382_s22 = scalar_select %p2065_p8, 1, 0 }
  0x13   : > { %s2071_s23 = scalar_select %p364_p7, %s1921_s14, %s366_s19  }
  0x14   : > { %2383 = sst [smem:[#allocation12_spill]] %s2382_s22  ;;  %p485_p10 = pnand %p1661_p6, %p484_p9 }
  0x15   : > { %2384 = sst [smem:[#allocation13_spill]] %s2071_s23  ;;  %p564_p11 = scmp.lt.s32.totalorder (!%p485_p10), %s1925_s15, 1 }
  0x16   : > { %488 = sbr.rel (%p485_p10) target bundleno = 1216 (0x4c0), region = 72  ;;  %s1936_s14 = smov (!%p485_p10), 127  }
  0x17   : > { %s1685_s17 = sshll.u32 (!%p485_p10), %s1925_s15, 4 }
  0x18   : > { %s1513_s28 = scalar_lea.hbm (!%p485_p10), %s2367_s13, %s1685_s17 }
  0x1b   : > { %v612_v2 = vlaneseq  ;;  %s2075_s24 = scalar_select %p564_p11, %s1925_s15, 1  ;;  %v1935_v8 = vmov 0.0   ;;  %v1938_v14 = vmov 0   ;;  %v979_v19 = vld [vmem:[%s2362_s7 + $0x18] sm:$0xff]  ;;  %v978_v20 = vld [vmem:[%s2362_s7 + $0x10] sm:$0xff]  ;;  %v977_v22 = vld [vmem:[%s2362_s7 + $0x8] sm:$0xff] }
  0x1c   : > { %745 = vmatprep.mubr.f32.mxu0 %v1935_v8  ;;  %846 = vmatprep.mubr.f32.mxu1 %v1935_v8  ;;  %v1011_v21 = vld [vmem:[%s2363_s8 + $0x18] sm:$0xff]  ;;  %v1010_v23 = vld [vmem:[%s2363_s8 + $0x10] sm:$0xff]  ;;  %v976_v24 = vld [vmem:[%s2362_s7] sm:$0xff]  ;;  %vm636_vm0 = vcmask 1031168   ;;  %vm628_vm1 = vcmask 1039360   ;;  %vm668_vm2 = vcmask 195584  }
  0x1d   : > { %v613_v3 = vshrl.u32 %v612_v2, 7  ;;  %s1688_s25 = sshll.u32 %s2075_s24, 4  ;;  %s1666_s26 = sshll.u32 %s2075_s24, 1  ;;  %1850 = vset.pattern.permute.xlu1 %v1938_v14  ;;  %1849 = vset.pattern.permute.xlu0 %v1938_v14  ;;  %v1009_v25 = vld [vmem:[%s2363_s8 + $0x8] sm:$0xff]  ;;  %v1008_v26 = vld [vmem:[%s2363_s8] sm:$0xff]  ;;  %v642_v35 = vld [vmem:[%s2361_s6 + $0x10] sm:$0xff] }
  0x1e   : > { %s571_s11 = scalar_lea.vmem %s2355_s0, %s1688_s25  ;;  %s588_s21 = scalar_lea.vmem %s2357_s2, %s1666_s26  ;;  %v640_v33 = vld [vmem:[%s2361_s6] sm:$0xff]  ;;  %v641_v34 = vld [vmem:[%s2361_s6 + $0x8] sm:$0xff]  ;;  %v643_v36 = vld [vmem:[%s2361_s6 + $0x18] sm:$0xff]  ;;  %vm778_vm3 = vcmask 261120   ;;  %vm1141_vm4 = vcmask 785408   ;;  %vm1940_vm5 = vmmov 0  }
  0x1f   : > { %v2079_v4 = vsub.s32 0, %v613_v3  ;;  %v608_v5 = vld [vmem:[%s571_s11] sm:$0xff]  ;;  %s1690_s18 = sadd.s32 8, %s1688_s25  ;;  %s595_s16 = sadd.s32 1, %s1666_s26  ;;  %v1939_v3 = vmov 1.0  }
  0x20   : > { %v2087_v6 = vld [vmem:[%s588_s21] sm:$0x1]  ;;  %s580_s22 = scalar_lea.vmem %s2356_s1, %s1690_s18  ;;  %s596_s27 = scalar_lea.vmem %s2358_s3, %s595_s16 }
  0x21   : > { %v615_v7 = vrot.slane %v2087_v6, %v2079_v4  ;;  %v609_v9 = vld [vmem:[%s580_s22] sm:$0xff]  ;;  %s1937_s18 = smov 126   ;;  %s1691_s29 = sshll.u32 %s2075_s24, 5 }
  0x22   : > { %v2099_v10 = vld [vmem:[%s596_s27] sm:$0x1]  ;;  %s602_s22 = scalar_lea.vmem %s2359_s4, %s1691_s29  ;;  %s607_s26 = scalar_lea.vmem %s2360_s5, %s1691_s29 }
  0x23   : > { %v620_v11 = vmul.f32 %v615_v7, %v608_v5  ;;  %v619_v12 = vrot.slane %v2099_v10, %v2079_v4  ;;  %v646_v15 = vld [vmem:[%s602_s22 + $0x10] sm:$0xff]  ;;  %v647_v16 = vld [vmem:[%s602_s22 + $0x18] sm:$0xff]  ;;  %v645_v17 = vld [vmem:[%s602_s22 + $0x8] sm:$0xff]  ;;  %s562_s16 = sand.u32 1, %s1917_s30  }
  0x24   : > { %v644_v18 = vld [vmem:[%s602_s22] sm:$0xff]  ;;  %s563_s22 = scalar_lea.vmem [#allocation4], %s562_s16  ;;  %s1502_s11 = scalar_lea.sflag [#allocation5], %s562_s16 }
  0x25   : > { %624 = vrot.lane.b32.xlu1 %v620_v11, %s1936_s14  ;;  %632 = vrot.lane.b32.xlu0 %v620_v11, %s1937_s18  ;;  %v621_v13 = vmul.f32 %v619_v12, %v609_v9  ;;  %s1515_s23 = sshll.u32 %s563_s22, 4  ;;  %s1516_s23 = int_to_ptr.vmem [resolvable:$true] %s1515_s23 }
  0x26   : > { %s1857_s24 = scalar_lea.vmem %s1516_s23, 16 }
  0x27   : > { %p1858_p12 = scmp.ne.s32.totalorder %s1516_s23, %s1857_s24 }
  0x29   : > { %626 = vrot.lane.b32.xlu1 %v621_v13, %s1936_s14  ;;  %634 = vrot.lane.b32.xlu0 %v621_v13, %s1937_s18  ;;  %p1859_p13 = pnand %p1858_p12, %p2058_p4 }
  0x2b   : > { %p1860_p0 = pneg %p1859_p13 }
  0x2d   : > { %660 = vperm.xlu1 %1850, %v646_v15   ;;  %665 = vperm.xlu0 %1849, %v647_v16  }
  0x31   : > { %655 = vperm.xlu1 %1850, %v645_v17   ;;  %650 = vperm.xlu0 %1849, %v644_v18  }
  0x35   : > { %997 = vperm.xlu1 %1850, %v979_v19   ;;  %992 = vperm.xlu0 %1849, %v978_v20  }
  0x39   : > { %1029 = vperm.xlu1 %1850, %v1011_v21   ;;  %987 = vperm.xlu0 %1849, %v977_v22  }
  0x3d   : > { %1024 = vperm.xlu1 %1850, %v1010_v23   ;;  %982 = vperm.xlu0 %1849, %v976_v24  }
  0x41   : > { %1019 = vperm.xlu1 %1850, %v1009_v25   ;;  %1014 = vperm.xlu0 %1849, %v1008_v26  }
  0x45   : > { %1042 = vrot.lane.b32.xlu1 %v615_v7, %s1936_s14  ;;  %1044 = vrot.lane.b32.xlu0 %v619_v12, %s1936_s14 }
  0x97   : > { %v625_v27 = vpop.permute.xlu1 %624  ;;  %v633_v28 = vpop.permute.xlu0 %632 }
  0x9b   : > { %v627_v29 = vpop.permute.xlu1 %626  ;;  %v635_v30 = vpop.permute.xlu0 %634 }
  0x9c   : > { %707 = vmatprep.subr.mxu0 %v635_v30  ;;  %v637_v31 = vsel %vm636_vm0, %v633_v28, %v635_v30  ;;  %v629_v32 = vsel %vm628_vm1, %v625_v27, %v627_v29 }
  0x9d   : > { %708 = vmatpush1.msra.mxu0 %v637_v31 }
  0x9e   : > { %709 = vmatprep.subr.mxu0 %v627_v29 }
  0x9f   : > { %710 = vmatpush1.msra.mxu0 %v629_v32 }
  0xa0   : > { %711 = vmatprep.subr.mxu0 %v621_v13 }
  0xa1   : > { %712 = vmatpush1.msra.mxu0 %v620_v11 }
  0xa2   : > { %1672 = vmatmul.mubr.msk.f32.vlgmr.msra.gmra.mxu0 %vm668_vm2, %v640_v33 }
  0xa3   : > { %751 = vmatprep.mubr.f32.mxu0 %v1935_v8 }
  0xa6   : > { %1673 = vmatmul.mubr.msk.f32.gmra.mxu0 %vm668_vm2, %v641_v34 }
  0xa7   : > { %757 = vmatprep.mubr.f32.mxu0 %v1935_v8 }
  0xa8   : > { %v661_v42 = vpop.permute.xlu1 %660  ;;  %v666_v44 = vpop.permute.xlu0 %665 }
  0xaa   : > { %1674 = vmatmul.mubr.msk.f32.gmra.mxu0 %vm668_vm2, %v642_v35 }
  0xab   : > { %763 = vmatprep.mubr.f32.mxu0 %v1935_v8 }
  0xac   : > { %v656_v50 = vpop.permute.xlu1 %655  ;;  %v651_v54 = vpop.permute.xlu0 %650 }
  0xae   : > { %1675 = vmatmul.mubr.msk.f32.gmra.mxu0 %vm668_vm2, %v643_v36 }
  0xb0   : > { %v998_v19 = vpop.permute.xlu1 %997  ;;  %v993_v20 = vpop.permute.xlu0 %992 }
  0xb4   : > { %v1030_v29 = vpop.permute.xlu1 %1029  ;;  %v988_v30 = vpop.permute.xlu0 %987 }
  0xb8   : > { %v1025_v32 = vpop.permute.xlu1 %1024  ;;  %v983_v33 = vpop.permute.xlu0 %982 }
  0xbc   : > { %v1020_v36 = vpop.permute.xlu1 %1019 }
 0x162   : > { %v747_v37 = vpop.f32.mrf.mxu0 }
 0x163   : > { %v748_v59 = vadd.f32 %v747_v37, %v651_v54  ;;  %v1015_v37 = vpop.permute.xlu0 %1014 }
 0x164   : > { %v749_v38 = vpop.f32.mrf.mxu0 }
 0x165   : > { %v750_v57 = vadd.f32 %v749_v38, %v651_v54  ;;  %v2175_v0 = vmax.f32 %v748_v59, 0.0 }
 0x166   : > { %v753_v39 = vpop.f32.mrf.mxu0 }
 0x167   : > { %v754_v55 = vadd.f32 %v753_v39, %v656_v50  ;;  %v2172_v63 = vmax.f32 %v750_v57, 0.0  ;;  %v855_v13 = vmul.f32 %v2175_v0, %v2175_v0 }
 0x168   : > { %v755_v40 = vpop.f32.mrf.mxu0 }
 0x169   : > { %v756_v52 = vadd.f32 %v755_v40, %v656_v50  ;;  %v2169_v62 = vmax.f32 %v754_v55, 0.0  ;;  %v856_v12 = vmul.f32 %v2172_v63, %v2172_v63 }
 0x16a   : > { %v759_v41 = vpop.f32.mrf.mxu0 }
 0x16b   : > { %v760_v51 = vadd.f32 %v759_v41, %v661_v42  ;;  %v2166_v61 = vmax.f32 %v756_v52, 0.0  ;;  %v857_v11 = vmul.f32 %v2169_v62, %v2169_v62 }
 0x16c   : > { %v761_v43 = vpop.f32.mrf.mxu0 }
 0x16d   : > { %v762_v48 = vadd.f32 %v761_v43, %v661_v42  ;;  %v2163_v60 = vmax.f32 %v760_v51, 0.0  ;;  %v858_v9 = vmul.f32 %v2166_v61, %v2166_v61 }
 0x16e   : > { %v765_v45 = vpop.f32.mrf.mxu0 }
 0x16f   : > { %v766_v46 = vadd.f32 %v765_v45, %v666_v44  ;;  %v2160_v58 = vmax.f32 %v762_v48, 0.0  ;;  %v859_v7 = vmul.f32 %v2163_v60, %v2163_v60  ;;  %v1045_v48 = vpop.permute.xlu0 %1044 }
 0x170   : > { %v767_v47 = vpop.f32.mrf.mxu0 }
 0x171   : > { %v768_v49 = vadd.f32 %v767_v47, %v666_v44  ;;  %v2158_v56 = vmax.f32 %v766_v46, 0.0  ;;  %v860_v5 = vmul.f32 %v2160_v58, %v2160_v58  ;;  %v1043_v47 = vpop.permute.xlu1 %1042 }
 0x173   : > { %v2156_v53 = vmax.f32 %v768_v49, 0.0  ;;  %v861_v2 = vmul.f32 %v2158_v56, %v2158_v56 }
 0x175   : > { %806 = vmatprep.subr.mxu1 %v2156_v53  ;;  %v862_v1 = vmul.f32 %v2156_v53, %v2156_v53 }
 0x176   : > { %807 = vmatpush1.msra.mxu1 %v2158_v56 }
 0x177   : > { %808 = vmatprep.subr.mxu1 %v2160_v58 }
 0x178   : > { %809 = vmatpush1.msra.mxu1 %v2163_v60 }
 0x179   : > { %810 = vmatprep.subr.mxu1 %v2166_v61 }
 0x17a   : > { %811 = vmatpush1.msra.mxu1 %v2169_v62 }
 0x17b   : > { %812 = vmatprep.subr.mxu1 %v2172_v63 }
 0x17c   : > { %813 = vmatpush1.msra.mxu1 %v2175_v0 }
 0x17d   : > { %1676 = vmatmul.mubr.msk.f32.vlgmr.msra.gmra.mxu1 %vm778_vm3, %v1939_v3  ;;  %887 = vmatprep.subr.mxu1 %v862_v1 }
 0x17e   : > { %888 = vmatpush1.msra.mxu1 %v861_v2  ;;  %927 = vmatprep.mubr.f32.mxu1 %v1935_v8 }
 0x17f   : > { %889 = vmatprep.subr.mxu1 %v860_v5 }
 0x180   : > { %890 = vmatpush1.msra.mxu1 %v859_v7 }
 0x181   : > { %891 = vmatprep.subr.mxu1 %v858_v9 }
 0x182   : > { %892 = vmatpush1.msra.mxu1 %v857_v11 }
 0x183   : > { %893 = vmatprep.subr.mxu1 %v856_v12 }
 0x184   : > { %894 = vmatpush1.msra.mxu1 %v855_v13 }
 0x185   : > { %1677 = vmatmul.mubr.msk.f32.vlgmr.msra.gmra.mxu1 %vm778_vm3, %v1939_v3  ;;  %1755 = vmatprep.subr.mxu1 %v1935_v8 }
 0x186   : > { %1763 = vmatprep.mubr.msk.f32.mxu1 %vm1940_vm5, %v1935_v8 }
 0x23d   : > { %v848_v14 = vpop.f32.mrf.mxu1 }
 0x23e   : > { %v853_v16 = vmul.f32 0.03125, %v848_v14 }
 0x23f   : > { %v850_v15 = vpop.f32.mrf.mxu1 }
 0x240   : > { %v854_v17 = vmul.f32 0.03125, %v850_v15  ;;  %v936_v21 = vmul.f32 %v853_v16, %v853_v16  ;;  %v947_v34 = vrot.slane %v853_v16, %v2079_v4 }
 0x242   : > { %v937_v24 = vmul.f32 %v854_v17, %v854_v17  ;;  %v951_v35 = vrot.slane %v854_v17, %v2079_v4  ;;  %v956_v39 = vsub.f32 %v2163_v60, %v947_v34  ;;  %v958_v40 = vsub.f32 %v2158_v56, %v947_v34 }
 0x243   : > { %v954_v43 = vsub.f32 %v2169_v62, %v947_v34  ;;  %v952_v59 = vsub.f32 %v2175_v0, %v947_v34  ;;  %v1046_v60 = vsel %vm628_vm1, %v1043_v47, %v1045_v48 }
 0x244   : > { %v957_v44 = vsub.f32 %v2160_v58, %v951_v35  ;;  %v959_v45 = vsub.f32 %v2156_v53, %v951_v35  ;;  %v955_v51 = vsub.f32 %v2166_v61, %v951_v35  ;;  %v953_v2 = vsub.f32 %v2172_v63, %v951_v35 }
 0x245   : > { %v929_v18 = vpop.f32.mrf.mxu1 }
 0x246   : > { %v934_v22 = vmul.f32 0.03125, %v929_v18 }
 0x247   : > { %v931_v23 = vpop.f32.mrf.mxu1 }
 0x248   : > { %v938_v25 = vsub.f32 %v934_v22, %v936_v21  ;;  %v935_v26 = vmul.f32 0.03125, %v931_v23 }
 0x24a   : > { %v940_v27 = vadd.f32 0.0001, %v938_v25  ;;  %v939_v28 = vsub.f32 %v935_v26, %v937_v24  ;;  %v1113_v26 = vld [vmem:[%s2364_s9] sm:$0xff] }
 0x24b   : > { %1749 = vmatprep.mubr.msk.f32.mxu0 %vm1141_vm4, %v1113_v26 }
 0x24c   : > { %1851 = vrsqrt.f32 %v940_v27  ;;  %v941_v31 = vadd.f32 0.0001, %v939_v28  ;;  %v1120_v27 = vld [vmem:[%s607_s26 + $0x18] sm:$0xff]  ;;  %v1119_v28 = vld [vmem:[%s607_s26 + $0x10] sm:$0xff] }
 0x24e   : > { %1853 = vrsqrt.f32 %v941_v31  ;;  %v1467_v31 = vld [vmem:[#allocation2] sm:$0x1] }
 0x259   : > { %v1852_v38 = vpop.eup %1851 }
 0x25a   : > { %v963_v41 = vrot.slane %v1852_v38, %v2079_v4 }
 0x25b   : > { %v1854_v42 = vpop.eup %1853 }
 0x25c   : > { %v967_v46 = vrot.slane %v1854_v42, %v2079_v4  ;;  %v974_v49 = vmul.f32 %v963_v41, %v958_v40  ;;  %v972_v50 = vmul.f32 %v963_v41, %v956_v39  ;;  %v970_v52 = vmul.f32 %v963_v41, %v954_v43 }
 0x25d   : > { %v968_v5 = vmul.f32 %v963_v41, %v952_v59  ;;  %v1116_v59 = vld [vmem:[%s2364_s9 + $0x18] sm:$0xff] }
 0x25e   : > { %v1006_v54 = vmul.f32 %v998_v19, %v974_v49  ;;  %v975_v55 = vmul.f32 %v967_v46, %v959_v45  ;;  %v1004_v56 = vmul.f32 %v993_v20, %v972_v50  ;;  %v973_v57 = vmul.f32 %v967_v46, %v957_v44 }
 0x25f   : > { %v971_v1 = vmul.f32 %v967_v46, %v955_v51  ;;  %v1002_v11 = vmul.f32 %v988_v30, %v970_v52  ;;  %v969_v14 = vmul.f32 %v967_v46, %v953_v2  ;;  %v1000_v17 = vmul.f32 %v983_v33, %v968_v5 }
 0x260   : > { %v1038_v58 = vadd.f32 %v1030_v29, %v1006_v54  ;;  %v1007_v62 = vmul.f32 %v998_v19, %v975_v55  ;;  %v1005_v53 = vmul.f32 %v993_v20, %v973_v57  ;;  %v1036_v61 = vadd.f32 %v1025_v32, %v1004_v56  ;;  %v1114_v56 = vld [vmem:[%s2364_s9 + $0x8] sm:$0xff]  ;;  %v1115_v57 = vld [vmem:[%s2364_s9 + $0x10] sm:$0xff] }
 0x261   : > { %v1003_v0 = vmul.f32 %v988_v30, %v971_v1  ;;  %v1034_v16 = vadd.f32 %v1020_v36, %v1002_v11  ;;  %v1001_v19 = vmul.f32 %v983_v33, %v969_v14  ;;  %v1032_v21 = vadd.f32 %v1015_v37, %v1000_v17  ;;  %v1117_v30 = vld [vmem:[%s607_s26] sm:$0xff] }
 0x262   : > { %v2215_v7 = vmul.f32 %v1046_v60, %v1038_v58  ;;  %v1039_v9 = vadd.f32 %v1030_v29, %v1007_v62  ;;  %v1037_v13 = vadd.f32 %v1025_v32, %v1005_v53  ;;  %v2220_v15 = vmul.f32 %v1046_v60, %v1036_v61  ;;  %v1118_v29 = vld [vmem:[%s607_s26 + $0x8] sm:$0xff]  ;;  %v1480_v32 = vld [vmem:[#allocation3] sm:$0x1] }
 0x263   : > { %v1035_v18 = vadd.f32 %v1020_v36, %v1003_v0  ;;  %v2225_v20 = vmul.f32 %v1046_v60, %v1034_v16  ;;  %v1033_v23 = vadd.f32 %v1015_v37, %v1001_v19  ;;  %v2230_v24 = vmul.f32 %v1046_v60, %v1032_v21  ;;  %v1393_v16 = vld [vmem:[%s2365_s10] sm:$0x1] }
 0x264   : > { %1101 = vrot.lane.b32.xlu1 %v2215_v7, %s1937_s18  ;;  %v1056_v12 = vmul.f32 %v1045_v48, %v1039_v9  ;;  %v1054_v63 = vmul.f32 %v1045_v48, %v1037_v13 }
 0x265   : > { %v1052_v22 = vmul.f32 %v1045_v48, %v1035_v18  ;;  %v1050_v25 = vmul.f32 %v1045_v48, %v1033_v23 }
 0x266   : > { %1103 = vrot.lane.b32.xlu0 %v1056_v12, %s1937_s18 }
 0x268   : > { %1097 = vrot.lane.b32.xlu1 %v2220_v15, %s1937_s18 }
 0x26a   : > { %1099 = vrot.lane.b32.xlu0 %v1054_v63, %s1937_s18 }
 0x26c   : > { %1093 = vrot.lane.b32.xlu1 %v2225_v20, %s1937_s18 }
 0x26e   : > { %1095 = vrot.lane.b32.xlu0 %v1052_v22, %s1937_s18 }
 0x270   : > { %1089 = vrot.lane.b32.xlu1 %v2230_v24, %s1937_s18 }
 0x272   : > { %1091 = vrot.lane.b32.xlu0 %v1050_v25, %s1937_s18 }
 0x274   : > { %1077 = vrot.lane.b32.xlu1 %v2215_v7, %s1936_s14 }
 0x276   : > { %1079 = vrot.lane.b32.xlu0 %v1056_v12, %s1936_s14 }
 0x278   : > { %1073 = vrot.lane.b32.xlu1 %v2220_v15, %s1936_s14 }
 0x27a   : > { %1075 = vrot.lane.b32.xlu0 %v1054_v63, %s1936_s14 }
 0x27c   : > { %1069 = vrot.lane.b32.xlu1 %v2225_v20, %s1936_s14 }
 0x27e   : > { %1071 = vrot.lane.b32.xlu0 %v1052_v22, %s1936_s14 }
 0x280   : > { %1065 = vrot.lane.b32.xlu1 %v2230_v24, %s1936_s14 }
 0x282   : > { %1067 = vrot.lane.b32.xlu0 %v1050_v25, %s1936_s14  ;;  %s1941_s14 = smov [#allocation4]  }
 0x284   : > { %1138 = vperm.xlu1 %1850, %v1120_v27  }
 0x286   : > { %1133 = vperm.xlu0 %1849, %v1119_v28  }
 0x288   : > { %1128 = vperm.xlu1 %1850, %v1118_v29  }
 0x28a   : > { %1123 = vperm.xlu0 %1849, %v1117_v30  }
 0x28c   : > { %1470 = vperm.xlu1 %1850, %v1467_v31  }
 0x28e   : > { %1483 = vperm.xlu0 %1849, %v1480_v32  }
 0x290   : > { %1493 = vrot.lane.b32.xlu1 %v2087_v6, %s1937_s18 }
 0x292   : > { %1495 = vrot.lane.b32.xlu0 %v2099_v10, %s1937_s18  ;;  %s1861_s18 = sshll.u32 %s1941_s14, 4  ;;  %s1862_s18 = int_to_ptr.vmem [resolvable:$false] %s1861_s18 }
 0x293   : > { %s1863_s15 = scalar_lea.vmem %s1862_s18, 32  ;;  %p1864_p1 = scmp.lt.s32.totalorder %s1516_s23, %s1862_s18 }
 0x294   : > { %p1865_p2 = scmp.lt.s32.totalorder %s1863_s15, %s1857_s24 }
 0x296   : > { %p1866_p3 = por %p1865_p2, %p1864_p1 }
 0x298   : > { %p1867_p5 = pnand %p1866_p3, %p1860_p0 }
 0x2d6   : > { %v1102_v33 = vpop.permute.xlu1 %1101 }
 0x2d8   : > { %v1104_v34 = vpop.permute.xlu0 %1103 }
 0x2d9   : > { %v1108_v35 = vsel %vm636_vm0, %v1102_v33, %v1104_v34 }
 0x2da   : > { %1725 = vmatprep.subr.mxu0 %v1108_v35  ;;  %v1098_v36 = vpop.permute.xlu1 %1097 }
 0x2db   : > { %1726 = vmatpush3.msra.mxu0 %v1108_v35 }
 0x2dc   : > { %v1100_v37 = vpop.permute.xlu0 %1099 }
 0x2dd   : > { %v1107_v38 = vsel %vm636_vm0, %v1098_v36, %v1100_v37 }
 0x2de   : > { %1727 = vmatprep.subr.mxu0 %v1107_v38  ;;  %v1094_v39 = vpop.permute.xlu1 %1093 }
 0x2df   : > { %1728 = vmatpush3.msra.mxu0 %v1107_v38 }
 0x2e0   : > { %v1096_v40 = vpop.permute.xlu0 %1095 }
 0x2e1   : > { %v1106_v41 = vsel %vm636_vm0, %v1094_v39, %v1096_v40 }
 0x2e2   : > { %1729 = vmatprep.subr.mxu0 %v1106_v41  ;;  %v1090_v6 = vpop.permute.xlu1 %1089 }
 0x2e3   : > { %1730 = vmatpush3.msra.mxu0 %v1106_v41 }
 0x2e4   : > { %v1092_v10 = vpop.permute.xlu0 %1091 }
 0x2e5   : > { %v1105_v42 = vsel %vm636_vm0, %v1090_v6, %v1092_v10 }
 0x2e6   : > { %1731 = vmatprep.subr.mxu0 %v1105_v42  ;;  %v1078_v43 = vpop.permute.xlu1 %1077 }
 0x2e7   : > { %1732 = vmatpush3.msra.mxu0 %v1105_v42 }
 0x2e8   : > { %v1080_v44 = vpop.permute.xlu0 %1079 }
 0x2e9   : > { %v1084_v45 = vsel %vm628_vm1, %v1078_v43, %v1080_v44 }
 0x2ea   : > { %1733 = vmatprep.subr.mxu0 %v1084_v45  ;;  %v1074_v46 = vpop.permute.xlu1 %1073 }
 0x2eb   : > { %1734 = vmatpush3.msra.mxu0 %v1084_v45 }
 0x2ec   : > { %v1076_v47 = vpop.permute.xlu0 %1075 }
 0x2ed   : > { %v1083_v48 = vsel %vm628_vm1, %v1074_v46, %v1076_v47 }
 0x2ee   : > { %1735 = vmatprep.subr.mxu0 %v1083_v48  ;;  %v1070_v49 = vpop.permute.xlu1 %1069 }
 0x2ef   : > { %1736 = vmatpush3.msra.mxu0 %v1083_v48 }
 0x2f0   : > { %v1072_v50 = vpop.permute.xlu0 %1071 }
 0x2f1   : > { %v1082_v51 = vsel %vm628_vm1, %v1070_v49, %v1072_v50 }
 0x2f2   : > { %1737 = vmatprep.subr.mxu0 %v1082_v51  ;;  %v1066_v52 = vpop.permute.xlu1 %1065 }
 0x2f3   : > { %1738 = vmatpush3.msra.mxu0 %v1082_v51 }
 0x2f4   : > { %v1068_v54 = vpop.permute.xlu0 %1067 }
 0x2f5   : > { %v1081_v55 = vsel %vm628_vm1, %v1066_v52, %v1068_v54 }
 0x2f6   : > { %1739 = vmatprep.subr.mxu0 %v1081_v55 }
 0x2f7   : > { %1740 = vmatpush3.msra.mxu0 %v1081_v55 }
 0x2f8   : > { %1741 = vmatprep.subr.mxu0 %v2215_v7 }
 0x2f9   : > { %1742 = vmatpush3.msra.mxu0 %v2215_v7 }
 0x2fa   : > { %1743 = vmatprep.subr.mxu0 %v2220_v15 }
 0x2fb   : > { %1744 = vmatpush3.msra.mxu0 %v2220_v15 }
 0x2fc   : > { %1745 = vmatprep.subr.mxu0 %v2225_v20 }
 0x2fd   : > { %1746 = vmatpush3.msra.mxu0 %v2225_v20 }
 0x2fe   : > { %1747 = vmatprep.subr.mxu0 %v2230_v24 }
 0x2ff   : > { %1748 = vmatpush3.msra.mxu0 %v2230_v24  ;;  %v1139_v60 = vpop.permute.xlu1 %1138 }
 0x300   : > { %1750 = vmatmul.mubr.msk.f32.vlgmr.msra.gmra.mxu0 %vm1141_vm4, %v1114_v56  ;;  %1777 = vmatprep.subr.mxu0 %v1935_v8 }
 0x301   : > { %1752 = vmatprep.mubr.msk.f32.mxu0 %vm1141_vm4, %v1115_v57  ;;  %v1134_v62 = vpop.permute.xlu0 %1133 }
 0x303   : > { %v1129_v5 = vpop.permute.xlu1 %1128 }
 0x304   : > { %1753 = vmatmul.mubr.msk.f32.gmra.mxu0 %vm1141_vm4, %v1116_v59 }
 0x305   : > { %1785 = vmatprep.mubr.msk.f32.mxu0 %vm1940_vm5, %v1935_v8  ;;  %v1124_v12 = vpop.permute.xlu0 %1123 }
 0x307   : > { %v1471_v31 = vpop.permute.xlu1 %1470 }
 0x309   : > { %v1484_v32 = vpop.permute.xlu0 %1483 }
 0x30a   : > { %v1489_v37 = vrot.slane %v1484_v32, %v2079_v4 }
 0x30b   : > { %v1494_v35 = vpop.permute.xlu1 %1493 }
 0x30d   : > { %v1496_v34 = vpop.permute.xlu0 %1495 }
 0x30e   : > { %v1497_v39 = vsel %vm636_vm0, %v1494_v35, %v1496_v34 }
 0x3c0   : > { %v1751_v58 = vpop.f32.mrf.mxu0 }
 0x3c1   : > { %v1226_v9 = vadd.f32 %v1751_v58, %v1129_v5 }
 0x3c2   : > { %v1220_v53 = vpop.f32.mrf.mxu0 }
 0x3c3   : > { %v1221_v13 = vadd.f32 %v1220_v53, %v1124_v12  ;;  %v1240_v14 = vmax.f32 %v1226_v9, 0.0 }
 0x3c4   : > { %v1754_v1 = vpop.f32.mrf.mxu0 }
 0x3c5   : > { %v1236_v2 = vadd.f32 %v1754_v1, %v1139_v60  ;;  %v1239_v15 = vmax.f32 %v1221_v13, 0.0  ;;  %v1314_v18 = vmul.f32 %v1240_v14, %v1240_v14 }
 0x3c6   : > { %v1230_v7 = vpop.f32.mrf.mxu0 }
 0x3c7   : > { %v1242_v61 = vmax.f32 %v1236_v2, 0.0  ;;  %v1231_v11 = vadd.f32 %v1230_v7, %v1134_v62  ;;  %v1313_v19 = vmul.f32 %v1239_v15, %v1239_v15 }
 0x3c9   : > { %v1241_v0 = vmax.f32 %v1231_v11, 0.0  ;;  %1756 = vmatpush3.msra.mxu1 %v1242_v61  ;;  %1778 = vmatpush3.msra.mxu0 %v1242_v61  ;;  %v1316_v17 = vmul.f32 %v1242_v61, %v1242_v61 }
 0x3ca   : > { %1757 = vmatprep.subr.mxu1 %v1935_v8  ;;  %1779 = vmatprep.subr.mxu0 %v1935_v8 }
 0x3cb   : > { %1758 = vmatpush3.msra.mxu1 %v1241_v0  ;;  %1780 = vmatpush3.msra.mxu0 %v1241_v0  ;;  %v1315_v63 = vmul.f32 %v1241_v0, %v1241_v0 }
 0x3cc   : > { %1759 = vmatprep.subr.mxu1 %v1935_v8  ;;  %1781 = vmatprep.subr.mxu0 %v1935_v8 }
 0x3cd   : > { %1760 = vmatpush3.msra.mxu1 %v1240_v14  ;;  %1782 = vmatpush3.msra.mxu0 %v1240_v14 }
 0x3ce   : > { %1761 = vmatprep.subr.mxu1 %v1935_v8  ;;  %1783 = vmatprep.subr.mxu0 %v1935_v8 }
 0x3cf   : > { %1762 = vmatpush3.msra.mxu1 %v1239_v15  ;;  %1784 = vmatpush3.msra.mxu0 %v1239_v15 }
 0x3d0   : > { %1764 = vmatmul.mubr.msk.f32.vlgmr.msra.gmra.mxu1 %vm778_vm3, %v1939_v3  ;;  %1766 = vmatprep.subr.mxu1 %v1935_v8 }
 0x3d1   : > { %1767 = vmatpush3.msra.mxu1 %v1316_v17  ;;  %1786 = vmatmul.mubr.msk.f32.vlgmr.msra.gmra.mxu0 %vm778_vm3, %v1393_v16 }
 0x3d2   : > { %1768 = vmatprep.subr.mxu1 %v1935_v8  ;;  %1774 = vmatprep.mubr.msk.f32.mxu1 %vm1940_vm5, %v1935_v8 }
 0x3d3   : > { %1769 = vmatpush3.msra.mxu1 %v1315_v63 }
 0x3d4   : > { %1770 = vmatprep.subr.mxu1 %v1935_v8 }
 0x3d5   : > { %1771 = vmatpush3.msra.mxu1 %v1314_v18 }
 0x3d6   : > { %1772 = vmatprep.subr.mxu1 %v1935_v8  ;;  %v1476_v8 = vrot.slane %v1471_v31, %v2079_v4 }
 0x3d7   : > { %1773 = vmatpush3.msra.mxu1 %v1313_v19 }
 0x3d8   : > { %1775 = vmatmul.mubr.msk.f32.vlgmr.msra.gmra.mxu1 %vm778_vm3, %v1939_v3 }
 0x490   : > { %v1309_v20 = vpop.f32.mrf.mxu1 }
 0x491   : > { %v1463_v21 = vpop.f32.mrf.mxu0  ;;  %v1387_v24 = vmul.f32 0.03125, %v1309_v20 }
 0x492   : > { %v1765_v22 = vpop.f32.mrf.mxu1 }
 0x493   : > { %v1787_v23 = vpop.f32.mrf.mxu0  ;;  %v1389_v26 = vmul.f32 %v1387_v24, %v1387_v24  ;;  %v1477_v33 = vmul.f32 %v1476_v8, %v1387_v24 }
 0x495   : > { %v1478_v3 = vsub.f32 %v1463_v21, %v1477_v33 }
 0x498   : > { %v1383_v25 = vpop.f32.mrf.mxu1 }
 0x499   : > { %v1388_v27 = vmul.f32 0.03125, %v1383_v25 }
 0x49a   : > { %v1776_v28 = vpop.f32.mrf.mxu1 }
 0x49b   : > { %v1390_v29 = vsub.f32 %v1388_v27, %v1389_v26 }
 0x49d   : > { %v1391_v30 = vadd.f32 0.0001, %v1390_v29 }
 0x49f   : > { %1855 = vrsqrt.f32 %v1391_v30 }
 0x4ac   : > { %v1856_v36 = vpop.eup %1855 }
 0x4ad   : > { %v1479_v38 = vmul.f32 %v1856_v36, %v1478_v3 }
 0x4af   : > { %v1490_v40 = vadd.f32 %v1489_v37, %v1479_v38 }
 0x4b1   : > { %v1499_v41 = vmul.f32 %v1497_v39, %v1490_v40 }
 0x4b3   : > { %1500 = vst [vmem:[%s563_s22] sm:$0x1] %v1499_v41 }
 0x4b4   : > { %1870 = shalt.err (!%p1867_p5)
}
 0x4b5   : > { %s1871_s29 = scalar_lea.hbm %s1513_s28, 16  ;;  %s1875_s21 = scalar_lea.hbm %s2367_s13, 32 }
 0x4b6   : > { %p1872_p6 = scmp.ne.s32.totalorder %s1513_s28, %s1871_s29  ;;  %p1876_p10 = scmp.lt.s32.totalorder %s1513_s28, %s2367_s13 }
 0x4b7   : > { %p1877_p11 = scmp.lt.s32.totalorder %s1875_s21, %s1871_s29 }
 0x4b8   : > { %p1873_p7 = pnand %p1872_p6, %p2058_p4 }
 0x4b9   : > { %p1878_p12 = por %p1877_p11, %p1876_p10 }
 0x4ba   : > { %p1874_p9 = pneg %p1873_p7 }
 0x4bc   : > { %p1879_p13 = pnand %p1878_p12, %p1874_p9 }
 0x4be   : > { %1882 = shalt.err (!%p1879_p13)
}
 0x4bf   : > { %1788 = dma.vmem_to_hbm [thread:$0]  (%p2058_p4), %s1516_s23, 16, %s1513_s28, %s1502_s11  }
 0x4c0 PF: > { %s2385_s17 = sld [smem:[#allocation10_spill]] }
 0x4c1   : > { %s2386_s22 = sld [smem:[#allocation7_spill]] }
 0x4c6   : > { %p1794_p0 = scmp.ge.s32.totalorder %s2385_s17, 2 }
 0x4c7   : > { %s1527_s26 = sand.u32 1, %s2386_s22  }
 0x4c8   : > { %p1791_p1 = pnand %p1794_p0, %p2065_p8  ;;  %s1528_s24 = scalar_lea.sflag [#allocation5], %s1527_s26 }
 0x4ca   : > { %p1792_p2 = pneg %p1791_p1 }
 0x4cc   : > { %1908 = dma.done.wait (%p1792_p2), %s1528_s24, 16  }
 0x4cd   : > { %1910 = vsyncadd (%p1792_p2), %s1528_s24, 4294967280  ;;  %s30_s17 = sadd.s32 1, %s2385_s17   ;;  %s2388_s14 = sld [smem:[#allocation8_spill]] }
 0x4ce   : > { %p27_p3 = scmp.ge.s32.totalorder %s30_s17, 4   ;;  %s2389_s18 = sld [smem:[#allocation13_spill]] }
 0x4cf   : > { %s2390_s15 = sld [smem:[#allocation9_spill]]  ;;  %s2392_s29 = smov %s1917_s30 }
 0x4d0   : > { %s2391_s16 = sld [smem:[#allocation11_spill]]  ;;  %29 = sbr.rel (!%p27_p3) target bundleno = 7 (0x7), region = 122 }
 0x4d3   : > { %s2393_s30 = smov %s2388_s14 }
 0x4d4   : > { %s2394_s14 = smov %s2389_s18 }
 0x4d5   :  { %1532 = vsyncpa [#allocation5], 1 }
 0x4d6   :  { %1534 = vsyncpa [#allocation5 + $0x1], 1 }

</bundles_post_ra>
